<compile_context>
chip_gen: v6e
topology: v6e:2x2x1
jax: 0.10.0
libtpu: 0.0.40
codegen_flags: <defaults>
</compile_context>

<pallas_src>
import jax
import jax.numpy as jnp
from jax import lax
from jax.experimental import pallas as pl
from jax.experimental.pallas import tpu as pltpu

_EPS = 1e-8              # torch.cosine_similarity default eps
_EPS2 = _EPS * _EPS      # used with rsqrt on squared norms (sqrt(max(n2, eps^2)) == max(n, eps))
_VMEM_LIMIT = 64 * 1024 * 1024


def _cosine_sim(pre, cur):
    """Cosine similarity over the channel (sublane) axis. pre/cur: (C, T) -> (1, T)."""
    dot = jnp.sum(pre * cur, axis=0, keepdims=True)
    n2p = jnp.sum(pre * pre, axis=0, keepdims=True)
    n2c = jnp.sum(cur * cur, axis=0, keepdims=True)
    # dot / (max(|pre|, eps) * max(|cur|, eps)) with a single EUP rsqrt.
    return dot * lax.rsqrt(jnp.maximum(n2p, _EPS2) * jnp.maximum(n2c, _EPS2))


def _blend_store(sim, hid, cur, w, b, out_ref):
    """x_cat = [hid*sim ; cur*(1-sim)] along channels; out = w @ x_cat + b (single MXU matmul)."""
    x_cat = jnp.concatenate([hid * sim, cur * (1.0 - sim)], axis=0)       # (Ch+Ck, T)
    y = jnp.dot(w, x_cat, preferred_element_type=jnp.float32)             # (Cout, T) lane-dense
    out_ref[...] = (y + b).astype(out_ref.dtype)


# ----------------------------- single-pass kernel (HW fits in one block) -----------------------------
def _tm_fused_kernel(pre_ref, cur_ref, hid_ref, w_ref, b_ref, out_ref):
    # pre/cur: (Ck, HW)  hid: (Ch, HW)  w: (Cout, Ch+Ck)  b: (Cout, 1)  out: (Cout, HW)
    pre = pre_ref[...]
    cur = cur_ref[...]
    cos = _cosine_sim(pre, cur)                       # (1, HW)
    sim = jnp.exp(cos - jnp.max(cos))                 # == exp(cos)/max(exp(cos)), exact
    _blend_store(sim, hid_ref[...], cur, w_ref[...], b_ref[...], out_ref)


# ----------------------------- two-pass tiled path (large HW) -----------------------------
def _tm_simmax_kernel(pre_ref, cur_ref, smax_ref):
    # pre/cur: (Ck, T)   smax: (1, 128) resident accumulator (per-batch running max, replicated over lanes)
    t = pl.program_id(1)
    tile_max = jnp.max(_cosine_sim(pre_ref[...], cur_ref[...]))           # scalar

    @pl.when(t == 0)
    def _init():
        smax_ref[...] = jnp.full(smax_ref.shape, tile_max, smax_ref.dtype)

    @pl.when(t > 0)
    def _acc():
        smax_ref[...] = jnp.maximum(smax_ref[...], tile_max)


def _tm_blend_kernel(pre_ref, cur_ref, hid_ref, smax_ref, w_ref, b_ref, out_ref):
    # pre/cur: (Ck, T)  hid: (Ch, T)  smax: (1, 128)  w: (Cout, Ch+Ck)  b: (Cout, 1)  out: (Cout, T)
    pre = pre_ref[...]
    cur = cur_ref[...]
    cos = _cosine_sim(pre, cur)                       # (1, T)
    s_max = jnp.max(smax_ref[...])                    # per-batch GLOBAL max (pass 1)
    sim = jnp.exp(cos - s_max)
    _blend_store(sim, hid_ref[...], cur, w_ref[...], b_ref[...], out_ref)


def _choose_hw_tile(hw, ck, ch, cout, max_tile_hw=None, vmem_budget_bytes=12 * 1024 * 1024):
    """Pick a lane-aligned HW tile so double-buffered blocks stay well under scoped VMEM."""
    if max_tile_hw is None:
        bytes_per_col = 4 * 2 * (2 * ck + ch + cout)   # f32, double-buffered in + out blocks
        max_tile_hw = max(128, (vmem_budget_bytes // bytes_per_col) // 128 * 128)
    if hw <= max_tile_hw:
        return hw, 1
    t = (max_tile_hw // 128) * 128
    while t >= 128:
        if hw % t == 0:
            return t, hw // t
        t -= 128
    # TODO(synk): ragged HW (no 128-aligned divisor) would need masked tiles; fall back to one block.
    return hw, 1


def template_matching(pre_key, pre_mask, cur_key, hidden, weight, bias, *, max_tile_hw=None):
    """pre_key/cur_key: (B, Ck, H, W); hidden: (B, Ch, H, W); weight: (Cout, Ck+Ch, 1, 1); bias: (Cout,).
    pre_mask is accepted for API parity but unused (matches the PyTorch forward)."""
    del pre_mask
    B, Ck, H, W = pre_key.shape
    Ch = hidden.shape[1]
    Cout = weight.shape[0]
    HW = H * W
    Ctot = Ch + Ck

    # NCHW -> (B, C, HW): free reshapes, no transposes.
    pre = pre_key.reshape(B, Ck, HW)
    cur = cur_key.reshape(B, Ck, HW)
    hid = hidden.reshape(B, Ch, HW)
    w2 = weight.reshape(Cout, Ctot).astype(jnp.float32)   # cat order: (hidden*sim, cur*(1-sim))
    b2 = bias.reshape(Cout, 1).astype(jnp.float32)

    T, nT = _choose_hw_tile(HW, Ck, Ch, Cout, max_tile_hw)

    if nT == 1:
        # Whole HW of one batch per grid step: per-batch max is local, one fused kernel.
        out = pl.pallas_call(
            _tm_fused_kernel,
            out_shape=jax.ShapeDtypeStruct((B, Cout, HW), jnp.float32),
            grid_spec=pltpu.PrefetchScalarGridSpec(
                num_scalar_prefetch=0,
                grid=(B,),
                in_specs=[
                    pl.BlockSpec((None, Ck, HW), lambda b: (b, 0, 0)),   # pre_key
                    pl.BlockSpec((None, Ck, HW), lambda b: (b, 0, 0)),   # cur_key
                    pl.BlockSpec((None, Ch, HW), lambda b: (b, 0, 0)),   # hidden
                    pl.BlockSpec((Cout, Ctot), lambda b: (0, 0)),        # fused 1x1-conv weight
                    pl.BlockSpec((Cout, 1), lambda b: (0, 0)),           # bias
                ],
                out_specs=pl.BlockSpec((None, Cout, HW), lambda b: (b, 0, 0)),
            ),
            compiler_params=pltpu.CompilerParams(
                dimension_semantics=("parallel",),
                vmem_limit_bytes=_VMEM_LIMIT),
        )(pre, cur, hid, w2, b2)
    else:
        # Pass 1: per-batch global max of the cosine similarity (HW axis is a reduction).
        smax = pl.pallas_call(
            _tm_simmax_kernel,
            out_shape=jax.ShapeDtypeStruct((B, 1, 128), jnp.float32),
            grid_spec=pltpu.PrefetchScalarGridSpec(
                num_scalar_prefetch=0,
                grid=(B, nT),
                in_specs=[
                    pl.BlockSpec((None, Ck, T), lambda b, t: (b, 0, t)),
                    pl.BlockSpec((None, Ck, T), lambda b, t: (b, 0, t)),
                ],
                out_specs=pl.BlockSpec((None, 1, 128), lambda b, t: (b, 0, 0)),
            ),
            compiler_params=pltpu.CompilerParams(
                dimension_semantics=("parallel", "arbitrary"),
                vmem_limit_bytes=_VMEM_LIMIT),
        )(pre, cur)

        # Pass 2: tiled blend, fully parallel over (batch, HW tile) — feeds both TCs on v7x.
        out = pl.pallas_call(
            _tm_blend_kernel,
            out_shape=jax.ShapeDtypeStruct((B, Cout, HW), jnp.float32),
            grid_spec=pltpu.PrefetchScalarGridSpec(
                num_scalar_prefetch=0,
                grid=(B, nT),
                in_specs=[
                    pl.BlockSpec((None, Ck, T), lambda b, t: (b, 0, t)),   # pre_key
                    pl.BlockSpec((None, Ck, T), lambda b, t: (b, 0, t)),   # cur_key
                    pl.BlockSpec((None, Ch, T), lambda b, t: (b, 0, t)),   # hidden
                    pl.BlockSpec((None, 1, 128), lambda b, t: (b, 0, 0)),  # per-batch cos max
                    pl.BlockSpec((Cout, Ctot), lambda b, t: (0, 0)),       # weight
                    pl.BlockSpec((Cout, 1), lambda b, t: (0, 0)),          # bias
                ],
                out_specs=pl.BlockSpec((None, Cout, T), lambda b, t: (b, 0, t)),
            ),
            compiler_params=pltpu.CompilerParams(
                dimension_semantics=("parallel", "parallel"),
                vmem_limit_bytes=_VMEM_LIMIT),
        )(pre, cur, hid, smax, w2, b2)

    # (B, Cout, HW) -> NCHW: free reshape.
    return out.reshape(B, Cout, H, W)


def _reference(pre_key, cur_key, hidden, weight, bias):
    """Plain-JAX reference matching the PyTorch forward."""
    B, Ck, H, W = pre_key.shape
    pre = pre_key.reshape(B, Ck, H * W)
    cur = cur_key.reshape(B, Ck, H * W)
    dot = jnp.sum(pre * cur, axis=1)
    sim = dot / (jnp.maximum(jnp.linalg.norm(pre, axis=1), _EPS)
                 * jnp.maximum(jnp.linalg.norm(cur, axis=1), _EPS))
    sim = jnp.exp(sim)
    sim = sim / jnp.max(sim, axis=-1, keepdims=True)
    sim = sim.reshape(B, 1, H, W)
    out = cur_key * (1.0 - sim)
    x = jnp.concatenate([hidden * sim, out], axis=1)
    w2 = weight.reshape(weight.shape[0], -1)
    return jnp.einsum('oi,bihw->bohw', w2, x) + bias.reshape(1, -1, 1, 1)


if __name__ == "__main__":
    # Small, module-consistent shapes: ch_in = C_hidden + C_key, 1x1 conv -> ch_out.
    B, C_key, C_hid, C_out, H, W = 2, 16, 16, 16, 32, 32

    key = jax.random.PRNGKey(0)
    k1, k2, k3, k4, k5, k6 = jax.random.split(key, 6)
    pre_key = jax.random.normal(k1, (B, C_key, H, W), jnp.float32)
    pre_mask = jax.random.normal(k2, (B, 1, H, W), jnp.float32)      # unused in forward
    cur_key = jax.random.normal(k3, (B, C_key, H, W), jnp.float32)
    hidden = jax.random.normal(k4, (B, C_hid, H, W), jnp.float32)

    # Deterministic synthetic parameters for blend = Conv2d(C_hid + C_key, C_out, 1, 1)
    weight = jax.random.normal(k5, (C_out, C_hid + C_key, 1, 1), jnp.float32) * 0.05
    bias = jax.random.normal(k6, (C_out,), jnp.float32) * 0.05

    y_ref = _reference(pre_key, cur_key, hidden, weight, bias)

    # Path 1: fused single-pass (HW fits one block per batch).
    y1 = template_matching(pre_key, pre_mask, cur_key, hidden, weight, bias)
    jax.block_until_ready(y1)
    assert y1.shape == (B, C_out, H, W)
    assert jnp.allclose(y1, y_ref, atol=1e-4, rtol=1e-4), "fused-path mismatch vs reference"

    # Path 2: two-pass HW-tiled (exercise the large-HW / v7x code path with a forced small tile).
    y2 = template_matching(pre_key, pre_mask, cur_key, hidden, weight, bias, max_tile_hw=256)
    jax.block_until_ready(y2)
    assert y2.shape == (B, C_out, H, W)
    assert jnp.allclose(y2, y_ref, atol=1e-4, rtol=1e-4), "tiled-path mismatch vs reference"

    print("KERNEL_OK")
</pallas_src>

<mosaic_0001>
module attributes {stable_mosaic.version = 11 : i64} {
  func.func @_tm_fused_kernel(%arg0: i32, %arg1: memref<1x16x1024xf32, #tpu.memory_space<vmem>>, %arg2: memref<1x16x1024xf32, #tpu.memory_space<vmem>>, %arg3: memref<1x16x1024xf32, #tpu.memory_space<vmem>>, %arg4: memref<16x32xf32, #tpu.memory_space<vmem>>, %arg5: memref<16x1xf32, #tpu.memory_space<vmem>>, %arg6: memref<1x16x1024xf32, #tpu.memory_space<vmem>>) attributes {dimension_semantics = [#tpu.dimension_semantics<parallel>], iteration_bounds = array<i64: 2>, scalar_prefetch = 0 : i64, scratch_operands = 0 : i64, tpu.core_type = #tpu.core_type<tc>, window_params = [{transform_indices = @transform_0, window_bounds = array<i64: 1, 16, 1024>}, {transform_indices = @transform_1, window_bounds = array<i64: 1, 16, 1024>}, {transform_indices = @transform_2, window_bounds = array<i64: 1, 16, 1024>}, {pipeline_mode = #tpu.pipeline_mode<synchronous>, transform_indices = @transform_3, window_bounds = array<i64: 16, 32>}, {pipeline_mode = #tpu.pipeline_mode<synchronous>, transform_indices = @transform_4, window_bounds = array<i64: 16, 1>}, {transform_indices = @transform_5, window_bounds = array<i64: 1, 16, 1024>}]} {
    %c0 = arith.constant 0 : index
    %c0_0 = arith.constant 0 : index
    %c0_1 = arith.constant 0 : index
    %0 = vector.load %arg1[%c0, %c0_0, %c0_1] : memref<1x16x1024xf32, #tpu.memory_space<vmem>>, vector<1x16x1024xf32>
    %1 = vector.shape_cast %0 : vector<1x16x1024xf32> to vector<16x1024xf32>
    %c0_2 = arith.constant 0 : index
    %c0_3 = arith.constant 0 : index
    %c0_4 = arith.constant 0 : index
    %2 = vector.load %arg2[%c0_2, %c0_3, %c0_4] : memref<1x16x1024xf32, #tpu.memory_space<vmem>>, vector<1x16x1024xf32>
    %3 = vector.shape_cast %2 : vector<1x16x1024xf32> to vector<16x1024xf32>
    %4 = arith.mulf %1, %3 : vector<16x1024xf32>
    %cst = arith.constant dense<0.000000e+00> : vector<1024xf32>
    %5 = vector.multi_reduction <add>, %4, %cst [0] : vector<16x1024xf32> to vector<1024xf32>
    %6 = vector.shape_cast %5 : vector<1024xf32> to vector<1x1024xf32>
    %7 = arith.mulf %1, %1 : vector<16x1024xf32>
    %cst_5 = arith.constant dense<0.000000e+00> : vector<1024xf32>
    %8 = vector.multi_reduction <add>, %7, %cst_5 [0] : vector<16x1024xf32> to vector<1024xf32>
    %9 = vector.shape_cast %8 : vector<1024xf32> to vector<1x1024xf32>
    %10 = arith.mulf %3, %3 : vector<16x1024xf32>
    %cst_6 = arith.constant dense<0.000000e+00> : vector<1024xf32>
    %11 = vector.multi_reduction <add>, %10, %cst_6 [0] : vector<16x1024xf32> to vector<1024xf32>
    %12 = vector.shape_cast %11 : vector<1024xf32> to vector<1x1024xf32>
    %cst_7 = arith.constant 1.000000e-16 : f32
    %13 = vector.broadcast %cst_7 : f32 to vector<1x1024xf32>
    %14 = arith.maximumf %9, %13 : vector<1x1024xf32>
    %cst_8 = arith.constant 1.000000e-16 : f32
    %15 = vector.broadcast %cst_8 : f32 to vector<1x1024xf32>
    %16 = arith.maximumf %12, %15 : vector<1x1024xf32>
    %17 = arith.mulf %14, %16 : vector<1x1024xf32>
    %18 = math.rsqrt %17 : vector<1x1024xf32>
    %19 = arith.mulf %6, %18 : vector<1x1024xf32>
    %20 = vector.shape_cast %19 : vector<1x1024xf32> to vector<1x1x1024xf32>
    %cst_9 = arith.constant dense<0xFF800000> : vector<1xf32>
    %21 = vector.multi_reduction <maximumf>, %20, %cst_9 [1, 2] : vector<1x1x1024xf32> to vector<1xf32>
    %22 = vector.shape_cast %21 : vector<1xf32> to vector<1x1x1xf32>
    %23 = vector.extract %22[0, 0, 0] : f32 from vector<1x1x1xf32>
    %24 = vector.broadcast %23 : f32 to vector<1x1024xf32>
    %25 = arith.subf %19, %24 : vector<1x1024xf32>
    %26 = math.exp %25 : vector<1x1024xf32>
    %c0_10 = arith.constant 0 : index
    %c0_11 = arith.constant 0 : index
    %c0_12 = arith.constant 0 : index
    %27 = vector.load %arg3[%c0_10, %c0_11, %c0_12] : memref<1x16x1024xf32, #tpu.memory_space<vmem>>, vector<1x16x1024xf32>
    %28 = vector.shape_cast %27 : vector<1x16x1024xf32> to vector<16x1024xf32>
    %c0_13 = arith.constant 0 : index
    %c0_14 = arith.constant 0 : index
    %29 = vector.load %arg4[%c0_13, %c0_14] : memref<16x32xf32, #tpu.memory_space<vmem>>, vector<16x32xf32>
    %c0_15 = arith.constant 0 : index
    %c0_16 = arith.constant 0 : index
    %30 = vector.load %arg5[%c0_15, %c0_16] : memref<16x1xf32, #tpu.memory_space<vmem>>, vector<16x1xf32>
    %31 = vector.broadcast %26 : vector<1x1024xf32> to vector<16x1024xf32>
    %32 = arith.mulf %28, %31 : vector<16x1024xf32>
    %cst_17 = arith.constant 1.000000e+00 : f32
    %33 = vector.broadcast %cst_17 : f32 to vector<1x1024xf32>
    %34 = arith.subf %33, %26 : vector<1x1024xf32>
    %35 = vector.broadcast %34 : vector<1x1024xf32> to vector<16x1024xf32>
    %36 = arith.mulf %3, %35 : vector<16x1024xf32>
    %37 = tpu.concatenate %32, %36 in 0 : vector<16x1024xf32>, vector<16x1024xf32> -> vector<32x1024xf32>
    %cst_18 = arith.constant dense<0.000000e+00> : vector<16x1024xf32>
    %38 = tpu.matmul %29, %37, %cst_18 {dimension_numbers = #tpu.dot_dimension_numbers<[1], [0], [0], [1], [0, 0, 1, 1], [], []>} : vector<16x32xf32>, vector<32x1024xf32>, vector<16x1024xf32> -> vector<16x1024xf32>
    %39 = vector.broadcast %30 : vector<16x1xf32> to vector<16x1024xf32>
    %40 = arith.addf %38, %39 : vector<16x1024xf32>
    %c0_19 = arith.constant 0 : index
    %c0_20 = arith.constant 0 : index
    %c0_21 = arith.constant 0 : index
    %41 = vector.load %arg6[%c0_19, %c0_20, %c0_21] : memref<1x16x1024xf32, #tpu.memory_space<vmem>>, vector<1x16x1024xf32>
    %42 = vector.shape_cast %41 : vector<1x16x1024xf32> to vector<16x1024xf32>
    %43 = vector.shape_cast %40 : vector<16x1024xf32> to vector<1x16x1024xf32>
    tpu.vector_store %arg6[%c0_19, %c0_20, %c0_21], %43 {strides = array<i32>} : memref<1x16x1024xf32, #tpu.memory_space<vmem>>, vector<1x16x1024xf32>,
    return
  }
  func.func @transform_0(%arg0: i32) -> (i32, i32, i32) {
    %c0_i32 = arith.constant 0 : i32
    %c0_i32_0 = arith.constant 0 : i32
    %c0_i32_1 = arith.constant 0 : i32
    return %arg0, %c0_i32, %c0_i32_0 : i32, i32, i32
  }
  func.func @transform_1(%arg0: i32) -> (i32, i32, i32) {
    %c0_i32 = arith.constant 0 : i32
    %c0_i32_0 = arith.constant 0 : i32
    %c0_i32_1 = arith.constant 0 : i32
    return %arg0, %c0_i32, %c0_i32_0 : i32, i32, i32
  }
  func.func @transform_2(%arg0: i32) -> (i32, i32, i32) {
    %c0_i32 = arith.constant 0 : i32
    %c0_i32_0 = arith.constant 0 : i32
    %c0_i32_1 = arith.constant 0 : i32
    return %arg0, %c0_i32, %c0_i32_0 : i32, i32, i32
  }
  func.func @transform_3(%arg0: i32) -> (i32, i32) {
    %c0_i32 = arith.constant 0 : i32
    %c0_i32_0 = arith.constant 0 : i32
    %c0_i32_1 = arith.constant 0 : i32
    return %c0_i32, %c0_i32_0 : i32, i32
  }
  func.func @transform_4(%arg0: i32) -> (i32, i32) {
    %c0_i32 = arith.constant 0 : i32
    %c0_i32_0 = arith.constant 0 : i32
    %c0_i32_1 = arith.constant 0 : i32
    return %c0_i32, %c0_i32_0 : i32, i32
  }
  func.func @transform_5(%arg0: i32) -> (i32, i32, i32) {
    %c0_i32 = arith.constant 0 : i32
    %c0_i32_0 = arith.constant 0 : i32
    %c0_i32_1 = arith.constant 0 : i32
    return %arg0, %c0_i32, %c0_i32_0 : i32, i32, i32
  }
}

</mosaic_0001>

<bundles_post_ra>
// kernel: tpu_custom_call.1
= control target key start
LH: loop header
LB: loop body
LE: loop exit
PB: predicated region body
PF: predicated region fallthrough
CT: control target
= control target key end

     0   :  { %s2039_s0 = inlined_call_operand.hbm [shape: f32[2,16,1024], index: 0, kind: input, shape index: {}]   ;;  %s2040_s1 = inlined_call_operand.hbm [shape: f32[2,16,1024], index: 1, kind: input, shape index: {}]   ;;  %s2041_s2 = inlined_call_operand.hbm [shape: f32[2,16,1024], index: 2, kind: input, shape index: {}]   ;;  %s2042_s3 = inlined_call_operand.vmem [shape: f32[16,32], index: 3, kind: input, shape index: {}]   ;;  %s2043_s4 = inlined_call_operand.vmem [shape: f32[16,1], index: 4, kind: input, shape index: {}]   ;;  %s2044_s5 = inlined_call_operand.hbm [shape: f32[2,16,1024], index: 5, kind: output, shape index: {}]  }
   0x1   :  { %2057 = sst [smem:[#allocation18_spill]] %s2039_s0 }
   0x2   :  { %2058 = sst [smem:[#allocation19_spill]] %s2040_s1 }
   0x3   :  { %10 = vsyncpa [#allocation3], 0 }
   0x4   :  { %12 = vsyncpa [#allocation3 + $0x1], 0 }
   0x5   :  { %13 = vsyncpa [#allocation6], 0 }
   0x6   :  { %15 = vsyncpa [#allocation6 + $0x1], 0 }
   0x7   :  { %16 = vsyncpa [#allocation4], 0 }
   0x8   :  { %18 = vsyncpa [#allocation4 + $0x1], 0  ;;  %s1500_s18 = smov 0   ;;  %s1502_s19 = smov 0  }
   0x9   :  { %s1504_s20 = smov 0   ;;  %s1506_s21 = smov 0  }
   0xa LB: > { %2059 = sst [smem:[#allocation12_spill]] %s1454_s20  ;;  %s1521_s22 = sadd.s32 4294967295, %s1458_s21   ;;  %s1458_s21 = sphi %s1506_s21, %s2096_s21   ;;  %s1454_s20 = sphi %s1504_s20, %s2093_s20   ;;  %s1450_s19 = sphi %s1502_s19, %s2095_s19   ;;  %s1446_s18 = sphi %s1500_s18, %s2094_s18  }
   0xb   : > { %s1174_s23 = sadd.s32 4294967294, %s1458_s21   ;;  %s1525_s24 = sadd.s32 1, %s1458_s21  }
   0xc   : > { %s31_s25 = sadd.s32 1, %s1454_s20  ;;  %s28_s26 = ssub.s32 %s1458_s21, %s1525_s24 }
   0xd   : > { %p38_p0 = scmp.ne.s32.totalorder %s1454_s20, %s1450_s19  ;;  %p29_p1 = scmp.eq.s32.totalorder %s28_s26, 0 }
   0xe   : > { %p39_p2 = scmp.eq.s32.totalorder %s1458_s21, 0  ;;  %p44_p3 = scmp.ne.s32.totalorder %s1450_s19, %s1446_s18 }
   0xf   : > { %p45_p4 = scmp.eq.s32.totalorder %s1521_s22, 0  ;;  %p162_p7 = scmp.eq.s32.totalorder %s1521_s22, 1 }
  0x10   : > { %s1537_s27 = scalar_select %p29_p1, %s1454_s20, %s31_s25  }
  0x11   : > { %p40_p5 = por %p39_p2, %p38_p0  ;;  %p1539_p6 = por %p45_p4, %p44_p3 }
  0x12   : > { %2060 = sst [smem:[#allocation13_spill]] %s1537_s27  ;;  %p168_p8 = scmp.eq.s32.totalorder %s1174_s23, 1 }
  0x13   : > { %s2061_s28 = scalar_select %p1539_p6, 1, 0 }
  0x14   : > { %p1232_p10 = scmp.lt.s32.totalorder %s1458_s21, 2  ;;  %p1546_p11 = por %p162_p7, %p38_p0 }
  0x15   : > { %p1550_p12 = por %p168_p8, %p44_p3  ;;  %s2045_s6 = sand.u32 1, %s1454_s20  }
  0x16   : > { %s2062_s29 = scalar_select %p1546_p11, 1, 0 }
  0x17   : > { %s2063_s30 = scalar_select %p1550_p12, 1, 0 }
  0x18   : > { %s1556_s7 = sshll.u32 %s1458_s21, 11  ;;  %s1560_s8 = sshll.u32 %s2045_s6, 7 }
  0x19   : > { %p1562_p13 = pnand %p1232_p10, %p40_p5  ;;  %s215_s10 = sand.u32 1, %s1458_s21  }
  0x1a   : > { %s2065_s1 = sld [smem:[#allocation19_spill]]  ;;  %s219_s14 = scalar_lea.vmem [#allocation5], %s1560_s8 }
  0x1b   : > { %s226_s15 = sshll.u32 %s219_s14, 4  ;;  %s1577_s16 = scalar_lea.sflag [#allocation6], %s215_s10  ;;  %s1574_s15 = int_to_ptr.vmem [resolvable:$true] %s226_s15 }
  0x1c   : > { %p1583_p2 = pneg %p1562_p13 }
  0x20   : > { %s1571_s13 = scalar_lea.hbm %s2065_s1, %s1556_s7  ;;  %s1311_s11 = scalar_lea.hbm %s2065_s1, 4096 }
  0x21   : > { %s1306_s17 = scalar_lea.hbm %s1571_s13, 2048  ;;  %p1312_p5 = scmp.lt.s32.totalorder %s1571_s13, %s2065_s1 }
  0x22   : > { %p1307_p1 = scmp.ne.s32.totalorder %s1571_s13, %s1306_s17  ;;  %p1313_p7 = scmp.lt.s32.totalorder %s1311_s11, %s1306_s17 }
  0x24   : > { %p1309_p3 = pnand %p1583_p2, %p1307_p1  ;;  %p1314_p8 = por %p1313_p7, %p1312_p5 }
  0x26   : > { %p1310_p4 = pneg %p1309_p3 }
  0x28   : > { %p1315_p10 = pnand %p1314_p8, %p1310_p4 }
  0x2a   : > { %1318 = shalt.err (!%p1315_p10)
}
  0x2b   : > { %s1319_s10 = scalar_lea.vmem %s1574_s15, 2048  ;;  %s1460_s6 = smov [#allocation5]  }
  0x2c   : > { %p1320_p9 = scmp.ne.s32.totalorder %s1574_s15, %s1319_s10  ;;  %s1324_s25 = sshll.u32 %s1460_s6, 4  ;;  %s1325_s25 = int_to_ptr.vmem [resolvable:$false] %s1324_s25 }
  0x2d   : > { %s1326_s26 = scalar_lea.vmem %s1325_s25, 4096  ;;  %p1327_p0 = scmp.lt.s32.totalorder %s1574_s15, %s1325_s25 }
  0x2e   : > { %p1322_p1 = pnand %p1320_p9, %p1583_p2  ;;  %p1328_p12 = scmp.lt.s32.totalorder %s1326_s26, %s1319_s10 }
  0x30   : > { %p1323_p3 = pneg %p1322_p1  ;;  %p1329_p11 = por %p1328_p12, %p1327_p0 }
  0x32   : > { %p1330_p6 = pnand %p1329_p11, %p1323_p3 }
  0x34   : > { %1333 = shalt.err (!%p1330_p6)
}
  0x35   : > { %s2048_s17 = smov 1024   ;;  %s2050_s11 = smov 64  }
  0x36   : > { %1224 = dma.hbm_to_vmem [thread:$0]  (!%p1562_p13), %s1571_s13, 2048, %s1574_s15, %s1577_s16, %s2048_s17, %s2048_s17, %s2050_s11  }
  0x37   : > { %p255_p9 = scmp.lt.s32.totalorder %s1458_s21, 3  ;;  %s2067_s0 = sld [smem:[#allocation18_spill]] }
  0x38   : > { %p2068_p6 = scmp.ge.s32.totalorder %s1458_s21, 1  ;;  %s198_s25 = scalar_lea.vmem [#allocation2], %s1560_s8 }
  0x39   : > { %s205_s26 = sshll.u32 %s198_s25, 4  ;;  %s2070_s1 = sand.u32 1, %s1454_s20   ;;  %s1623_s26 = int_to_ptr.vmem [resolvable:$true] %s205_s26 }
  0x3a   : > { %p1618_p11 = pnand %p2068_p6, %p255_p9  ;;  %s195_s13 = scalar_lea.sflag [#allocation3], %s2070_s1 }
  0x3c   : > { %s2069_s10 = scalar_select %p1618_p11, 1, 0 }
  0x3d   : > { %s1614_s14 = scalar_lea.hbm %s2067_s0, %s1556_s7  ;;  %s1339_s17 = scalar_lea.hbm %s2067_s0, 4096 }
  0x3e   : > { %s1334_s15 = scalar_lea.hbm %s1614_s14, 2048  ;;  %p1340_p5 = scmp.lt.s32.totalorder %s1614_s14, %s2067_s0 }
  0x3f   : > { %p1335_p12 = scmp.ne.s32.totalorder %s1614_s14, %s1334_s15  ;;  %p1341_p7 = scmp.lt.s32.totalorder %s1339_s17, %s1334_s15 }
  0x41   : > { %p1337_p0 = pnand %p1335_p12, %p1583_p2  ;;  %p1342_p8 = por %p1341_p7, %p1340_p5 }
  0x43   : > { %p1338_p4 = pneg %p1337_p0 }
  0x45   : > { %p1343_p10 = pnand %p1342_p8, %p1338_p4 }
  0x47   : > { %1346 = shalt.err (!%p1343_p10)
}
  0x48   : > { %s1347_s1 = scalar_lea.vmem %s1623_s26, 2048  ;;  %s1463_s25 = smov [#allocation2]  }
  0x49   : > { %p1348_p1 = scmp.ne.s32.totalorder %s1623_s26, %s1347_s1  ;;  %s1352_s6 = sshll.u32 %s1463_s25, 4  ;;  %s1353_s6 = int_to_ptr.vmem [resolvable:$false] %s1352_s6 }
  0x4a   : > { %s1354_s12 = scalar_lea.vmem %s1353_s6, 4096  ;;  %p1355_p6 = scmp.lt.s32.totalorder %s1623_s26, %s1353_s6 }
  0x4b   : > { %p1350_p3 = pnand %p1348_p1, %p1583_p2  ;;  %p1356_p12 = scmp.lt.s32.totalorder %s1354_s12, %s1347_s1 }
  0x4d   : > { %p1351_p9 = pneg %p1350_p3  ;;  %p1357_p0 = por %p1356_p12, %p1355_p6 }
  0x4f   : > { %p1358_p11 = pnand %p1357_p0, %p1351_p9 }
  0x51   : > { %1361 = shalt.err (!%p1358_p11)
}
  0x52   : > { %s2071_s27 = smov 64   ;;  %s2072_s17 = smov 1024  }
  0x53   : > { %1221 = dma.hbm_to_vmem [thread:$0]  (!%p1562_p13), %s1614_s14, 2048, %s1623_s26, %s195_s13, %s2072_s17, %s2072_s17, %s2071_s27  }
  0x54   : > { %s1654_s25 = scalar_lea.hbm %s2041_s2, %s1556_s7  ;;  %s240_s1 = scalar_lea.vmem [#allocation7], %s1560_s8 }
  0x55   : > { %s247_s6 = sshll.u32 %s240_s1, 4  ;;  %s1362_s12 = scalar_lea.hbm %s1654_s25, 2048  ;;  %s248_s6 = int_to_ptr.vmem [resolvable:$true] %s247_s6 }
  0x56   : > { %p1363_p11 = scmp.ne.s32.totalorder %s1654_s25, %s1362_s12  ;;  %s1367_s14 = scalar_lea.hbm %s2041_s2, 4096 }
  0x57   : > { %p1368_p7 = scmp.lt.s32.totalorder %s1654_s25, %s2041_s2  ;;  %p1369_p8 = scmp.lt.s32.totalorder %s1367_s14, %s1362_s12 }
  0x58   : > { %p1365_p4 = pnand %p1363_p11, %p1583_p2 }
  0x59   : > { %p1370_p10 = por %p1369_p8, %p1368_p7 }
  0x5a   : > { %p1366_p5 = pneg %p1365_p4 }
  0x5c   : > { %p1371_p1 = pnand %p1370_p10, %p1366_p5 }
  0x5e   : > { %1374 = shalt.err (!%p1371_p1)
}
  0x5f   : > { %s1375_s7 = scalar_lea.vmem %s248_s6, 2048  ;;  %s1464_s8 = smov [#allocation7]  }
  0x60   : > { %p1376_p3 = scmp.ne.s32.totalorder %s248_s6, %s1375_s7  ;;  %s1380_s11 = sshll.u32 %s1464_s8, 4  ;;  %s1381_s11 = int_to_ptr.vmem [resolvable:$false] %s1380_s11 }
  0x61   : > { %s1382_s15 = scalar_lea.vmem %s1381_s11, 4096  ;;  %p1383_p12 = scmp.lt.s32.totalorder %s248_s6, %s1381_s11 }
  0x62   : > { %p1378_p9 = pnand %p1376_p3, %p1583_p2  ;;  %p1384_p0 = scmp.lt.s32.totalorder %s1382_s15, %s1375_s7 }
  0x64   : > { %p1379_p6 = pneg %p1378_p9  ;;  %p1385_p11 = por %p1384_p0, %p1383_p12 }
  0x66   : > { %p1386_p4 = pnand %p1385_p11, %p1379_p6 }
  0x68   : > { %1389 = shalt.err (!%p1386_p4)
}
  0x69   : > { %1227 = dma.hbm_to_vmem [thread:$0]  (!%p1562_p13), %s1654_s25, 2048, %s248_s6, %s1577_s16, %s2072_s17, %s2072_s17, %s2071_s27  }
  0x6a   : > { %p2073_p2 = scmp.ne.s32.totalorder %s2069_s10, 0 }
  0x6c   : > { %259 = sbr.rel (%p2073_p2) target bundleno = 651 (0x28b), region = 40 }
  0x71   : > { %s1680_s0 = sand.u32 1, %s1450_s19   ;;  %p2074_p5 = scmp.ne.s32.totalorder %s2061_s28, 0 }
  0x72   : > { %s1683_s20 = sshll.u32 %s1680_s0, 7  ;;  %s262_s23 = scalar_lea.sflag [#allocation3], %s1680_s0 }
  0x73   : > { %s1687_s9 = scalar_lea.vmem [#allocation2], %s1683_s20 }
  0x74   : > { %1433 = dma.done.wait (%p2074_p5), %s262_s23, 2048  }
  0x75   : > { %1435 = vsyncadd (%p2074_p5), %s262_s23, 4294965248  ;;  %s270_s16 = sand.u32 1, %s1521_s22   ;;  %s1695_s27 = scalar_lea.vmem [#allocation5], %s1683_s20 }
  0x76   : > { %s271_s10 = scalar_lea.sflag [#allocation6], %s270_s16 }
  0x77   : > { %1437 = dma.done.wait (%p2074_p5), %s271_s10, 4096  }
  0x78   : > { %1439 = vsyncadd (%p2074_p5), %s271_s10, 4294963200  ;;  %v320_v0 = vld [vmem:[%s1687_s9] sm:$0xff]  ;;  %v321_v2 = vld [vmem:[%s1687_s9 + $0x8] sm:$0xff]  ;;  %s1901_s12 = scalar_lea.vmem [#allocation7], %s1683_s20  ;;  %vm713_vm0 = vcmask 261120   ;;  %s1971_s8 = scalar_lea.vmem [#allocation8], %s1683_s20 }
  0x79   : > { %v328_v1 = vld [vmem:[%s1687_s9 + $0x40] sm:$0xff]  ;;  %v329_v3 = vld [vmem:[%s1687_s9 + $0x48] sm:$0xff]  ;;  %v424_v4 = vmul.f32 %v320_v0, %v320_v0  ;;  %v425_v6 = vmul.f32 %v321_v2, %v321_v2  ;;  %v322_v10 = vld [vmem:[%s1687_s9 + $0x10] sm:$0xff]  ;;  %s1207_s11 = sshll.u32 %s1521_s22, 11  ;;  %s1058_s15 = sshll.u32 %s1971_s8, 4  ;;  %s1992_s15 = int_to_ptr.vmem [resolvable:$true] %s1058_s15 }
  0x7a   : > { %v432_v5 = vmul.f32 %v328_v1, %v328_v1  ;;  %v433_v7 = vmul.f32 %v329_v3, %v329_v3  ;;  %v1706_v8 = vld [vmem:[%s1695_s27] sm:$0xff]  ;;  %v323_v11 = vld [vmem:[%s1687_s9 + $0x18] sm:$0xff]  ;;  %v1714_v13 = vld [vmem:[%s1695_s27 + $0x8] sm:$0xff]  ;;  %v426_v58 = vmul.f32 %v322_v10, %v322_v10  ;;  %s1045_s22 = scalar_lea.sflag [#allocation4], %s1680_s0  ;;  %s1390_s16 = scalar_lea.vmem %s1992_s15, 2048 }
  0x7b   : > { %v324_v12 = vld [vmem:[%s1687_s9 + $0x20] sm:$0xff]  ;;  %v1720_v15 = vld [vmem:[%s1695_s27 + $0x48] sm:$0xff]  ;;  %v326_v17 = vld [vmem:[%s1687_s9 + $0x30] sm:$0xff]  ;;  %v352_v21 = vmul.f32 %v1706_v8, %v320_v0  ;;  %v353_v22 = vmul.f32 %v1714_v13, %v321_v2  ;;  %v427_v59 = vmul.f32 %v323_v11, %v323_v11  ;;  %p1391_p13 = scmp.ne.s32.totalorder %s1992_s15, %s1390_s16  ;;  %p2089_p7 = scmp.ne.s32.totalorder %s2062_s29, 0 }
  0x7c   : > { %v1708_v9 = vadd.f32 %v432_v5, %v424_v4  ;;  %v1717_v14 = vld [vmem:[%s1695_s27 + $0x40] sm:$0xff]  ;;  %v325_v16 = vld [vmem:[%s1687_s9 + $0x28] sm:$0xff]  ;;  %v330_v18 = vld [vmem:[%s1687_s9 + $0x50] sm:$0xff]  ;;  %v361_v24 = vmul.f32 %v1720_v15, %v329_v3  ;;  %v447_v30 = vadd.f32 %v433_v7, %v425_v6  ;;  %v428_v60 = vmul.f32 %v324_v12, %v324_v12  ;;  %s1467_s10 = smov [#allocation8]  }
  0x7d   : > { %v331_v19 = vld [vmem:[%s1687_s9 + $0x58] sm:$0xff]  ;;  %v1727_v20 = vld [vmem:[%s1695_s27 + $0x10] sm:$0xff]  ;;  %v360_v23 = vmul.f32 %v1717_v14, %v328_v1  ;;  %v332_v25 = vld [vmem:[%s1687_s9 + $0x60] sm:$0xff]  ;;  %v429_v61 = vmul.f32 %v325_v16, %v325_v16  ;;  %v430_v0 = vmul.f32 %v326_v17, %v326_v17  ;;  %p1392_p8 = pnand %p1391_p13, %p2089_p7 }
  0x7e   : > { %v333_v26 = vld [vmem:[%s1687_s9 + $0x68] sm:$0xff]  ;;  %v1736_v27 = vld [vmem:[%s1695_s27 + $0x18] sm:$0xff]  ;;  %v1739_v28 = vld [vmem:[%s1695_s27 + $0x20] sm:$0xff]  ;;  %v354_v36 = vmul.f32 %v1727_v20, %v322_v10  ;;  %v441_v39 = vrot.slane %v1708_v9, 4  ;;  %v375_v53 = vadd.f32 %v361_v24, %v353_v22  ;;  %v448_v57 = vrot.slane %v447_v30, 4 }
  0x7f   : > { %2075 = vst [vmem:[#allocation14_spill] sm:$0xff] %v1739_v28  ;;  %v1742_v29 = vld [vmem:[%s1695_s27 + $0x28] sm:$0xff]  ;;  %v327_v31 = vld [vmem:[%s1687_s9 + $0x38] sm:$0xff]  ;;  %v334_v32 = vld [vmem:[%s1687_s9 + $0x70] sm:$0xff]  ;;  %v355_v37 = vmul.f32 %v1736_v27, %v323_v11  ;;  %v356_v38 = vmul.f32 %v1739_v28, %v324_v12  ;;  %v368_v52 = vadd.f32 %v360_v23, %v352_v21  ;;  %v434_v11 = vmul.f32 %v330_v18, %v330_v18  ;;  %p1393_p10 = pneg %p1392_p8 }
  0x80   : > { %2076 = vst [vmem:[#allocation15_spill] sm:$0xff] %v1742_v29  ;;  %v1747_v33 = vld [vmem:[%s1695_s27 + $0x30] sm:$0xff]  ;;  %v1753_v35 = vld [vmem:[%s1695_s27 + $0x58] sm:$0xff]  ;;  %v1761_v41 = vld [vmem:[%s1695_s27 + $0x60] sm:$0xff]  ;;  %v357_v43 = vmul.f32 %v1742_v29, %v325_v16  ;;  %v431_v1 = vmul.f32 %v327_v31, %v327_v31  ;;  %v376_v3 = vrot.slane %v375_v53, 4  ;;  %v442_v21 = vadd.f32 %v441_v39, %v1708_v9 }
  0x81   : > { %2077 = vst [vmem:[#allocation16_spill] sm:$0xff] %v1747_v33  ;;  %v1750_v34 = vld [vmem:[%s1695_s27 + $0x50] sm:$0xff]  ;;  %v335_v40 = vld [vmem:[%s1687_s9 + $0x78] sm:$0xff]  ;;  %v1764_v42 = vld [vmem:[%s1695_s27 + $0x68] sm:$0xff]  ;;  %v358_v44 = vmul.f32 %v1747_v33, %v326_v17  ;;  %v363_v46 = vmul.f32 %v1753_v35, %v331_v19  ;;  %v364_v50 = vmul.f32 %v1761_v41, %v332_v25  ;;  %v369_v2 = vrot.slane %v368_v52, 4  ;;  %s1990_s9 = scalar_lea.hbm %s2044_s5, %s1207_s11 }
  0x82   : > { %v362_v45 = vmul.f32 %v1750_v34, %v330_v18  ;;  %v1771_v47 = vld [vmem:[%s1695_s27 + $0x38] sm:$0xff]  ;;  %v1774_v48 = vld [vmem:[%s1695_s27 + $0x70] sm:$0xff]  ;;  %v365_v51 = vmul.f32 %v1764_v42, %v333_v26  ;;  %v449_v10 = vadd.f32 %v448_v57, %v447_v30  ;;  %v435_v12 = vmul.f32 %v331_v19, %v331_v19 }
  0x83   : > { %2078 = vst [vmem:[#allocation17_spill] sm:$0xff] %v1771_v47  ;;  %v1777_v49 = vld [vmem:[%s1695_s27 + $0x78] sm:$0xff]  ;;  %v359_v54 = vmul.f32 %v1771_v47, %v327_v31  ;;  %v366_v55 = vmul.f32 %v1774_v48, %v334_v32  ;;  %v389_v63 = vadd.f32 %v363_v46, %v355_v37  ;;  %v1784_v4 = vadd.f32 %v364_v50, %v356_v38  ;;  %s1394_s27 = sshll.u32 %s1467_s10, 4  ;;  %s1395_s27 = int_to_ptr.vmem [resolvable:$false] %s1394_s27 }
  0x84   : > { %v367_v56 = vmul.f32 %v1777_v49, %v335_v40  ;;  %v382_v62 = vadd.f32 %v362_v45, %v354_v36  ;;  %v1786_v5 = vadd.f32 %v365_v51, %v357_v43  ;;  %v436_v16 = vmul.f32 %v332_v25, %v332_v25  ;;  %s1396_s28 = scalar_lea.vmem %s1395_s27, 4096  ;;  %p1397_p1 = scmp.lt.s32.totalorder %s1992_s15, %s1395_s27 }
  0x85   : > { %v1788_v6 = vadd.f32 %v366_v55, %v358_v44  ;;  %v437_v22 = vmul.f32 %v333_v26, %v333_v26  ;;  %v390_v17 = vrot.slane %v389_v63, 4  ;;  %v438_v24 = vmul.f32 %v334_v32, %v334_v32  ;;  %p1398_p3 = scmp.lt.s32.totalorder %s1396_s28, %s1390_s16 }
  0x86   : > { %v1790_v7 = vadd.f32 %v367_v56, %v359_v54  ;;  %v383_v23 = vrot.slane %v382_v62, 4  ;;  %v439_v31 = vmul.f32 %v335_v40, %v335_v40  ;;  %v1793_v36 = vadd.f32 %v369_v2, %v368_v52 }
  0x87   : > { %v1795_v37 = vadd.f32 %v376_v3, %v375_v53  ;;  %v443_v18 = vrot.slane %v442_v21, 2  ;;  %v450_v19 = vrot.slane %v449_v10, 2  ;;  %v454_v25 = vadd.f32 %v434_v11, %v426_v58  ;;  %p1399_p9 = por %p1398_p3, %p1397_p1 }
  0x88   : > { %v461_v26 = vadd.f32 %v435_v12, %v427_v59  ;;  %v468_v30 = vadd.f32 %v436_v16, %v428_v60  ;;  %v475_v39 = vadd.f32 %v437_v22, %v429_v61  ;;  %v482_v45 = vadd.f32 %v438_v24, %v430_v0 }
  0x89   : > { %v444_v32 = vadd.f32 %v443_v18, %v442_v21  ;;  %v451_v40 = vadd.f32 %v450_v19, %v449_v10  ;;  %v489_v46 = vadd.f32 %v439_v31, %v431_v1  ;;  %v455_v50 = vrot.slane %v454_v25, 4  ;;  %p1400_p6 = pnand %p1399_p9, %p1393_p10 }
  0x8a   : > { %v462_v51 = vrot.slane %v461_v26, 4  ;;  %v469_v52 = vrot.slane %v468_v30, 4  ;;  %v476_v53 = vrot.slane %v475_v39, 4  ;;  %v483_v56 = vrot.slane %v482_v45, 4 }
  0x8b   : > { %v445_v54 = vrot.slane %v444_v32, 1  ;;  %v452_v55 = vrot.slane %v451_v40, 1  ;;  %v490_v57 = vrot.slane %v489_v46, 4  ;;  %v456_v2 = vadd.f32 %v455_v50, %v454_v25 }
  0x8c   : > { %v463_v3 = vadd.f32 %v462_v51, %v461_v26  ;;  %v470_v9 = vadd.f32 %v469_v52, %v468_v30  ;;  %v477_v44 = vadd.f32 %v476_v53, %v475_v39  ;;  %v1801_v58 = vadd.f32 %v383_v23, %v382_v62 }
  0x8d   : > { %v1803_v59 = vadd.f32 %v390_v17, %v389_v63  ;;  %v484_v60 = vadd.f32 %v483_v56, %v482_v45  ;;  %v491_v61 = vadd.f32 %v490_v57, %v489_v46  ;;  %v457_v0 = vrot.slane %v456_v2, 2 }
  0x8e   : > { %v464_v1 = vrot.slane %v463_v3, 2  ;;  %v471_v21 = vrot.slane %v470_v9, 2  ;;  %v478_v10 = vrot.slane %v477_v44, 2  ;;  %v1805_v11 = vadd.f32 %v445_v54, %v444_v32 }
  0x8f   : > { %v1807_v12 = vadd.f32 %v452_v55, %v451_v40  ;;  %v485_v16 = vrot.slane %v484_v60, 2  ;;  %v492_v22 = vrot.slane %v491_v61, 2  ;;  %v458_v24 = vadd.f32 %v457_v0, %v456_v2 }
  0x90   : > { %v465_v31 = vadd.f32 %v464_v1, %v463_v3  ;;  %v472_v18 = vadd.f32 %v471_v21, %v470_v9  ;;  %v479_v19 = vadd.f32 %v478_v10, %v477_v44  ;;  %v496_v23 = vmul.f32 %v1706_v8, %v1706_v8 }
  0x91   : > { %v1809_v62 = vadd.f32 %v485_v16, %v484_v60  ;;  %v1811_v63 = vadd.f32 %v492_v22, %v491_v61  ;;  %v497_v17 = vmul.f32 %v1714_v13, %v1714_v13  ;;  %v459_v25 = vrot.slane %v458_v24, 1 }
  0x92   : > { %v466_v26 = vrot.slane %v465_v31, 1  ;;  %v473_v30 = vrot.slane %v472_v18, 1  ;;  %v480_v39 = vrot.slane %v479_v19, 1  ;;  %v498_v44 = vmul.f32 %v1727_v20, %v1727_v20 }
  0x93   : > { %v499_v9 = vmul.f32 %v1736_v27, %v1736_v27  ;;  %v1823_v45 = vadd.f32 %v459_v25, %v458_v24  ;;  %v500_v50 = vmul.f32 %v1739_v28, %v1739_v28  ;;  %v501_v51 = vmul.f32 %v1742_v29, %v1742_v29 }
  0x94   : > { %v1825_v46 = vadd.f32 %v466_v26, %v465_v31  ;;  %v1831_v52 = vadd.f32 %v473_v30, %v472_v18  ;;  %v1833_v53 = vadd.f32 %v480_v39, %v479_v19  ;;  %v502_v54 = vmul.f32 %v1747_v33, %v1747_v33 }
  0x95   : > { %v503_v55 = vmul.f32 %v1771_v47, %v1771_v47  ;;  %v504_v56 = vmul.f32 %v1717_v14, %v1717_v14  ;;  %v505_v57 = vmul.f32 %v1720_v15, %v1720_v15  ;;  %v506_v2 = vmul.f32 %v1750_v34, %v1750_v34 }
  0x96   : > { %v507_v3 = vmul.f32 %v1753_v35, %v1753_v35  ;;  %v508_v60 = vmul.f32 %v1761_v41, %v1761_v41  ;;  %v509_v61 = vmul.f32 %v1764_v42, %v1764_v42  ;;  %v510_v0 = vmul.f32 %v1774_v48, %v1774_v48 }
  0x97   : > { %v511_v1 = vmul.f32 %v1777_v49, %v1777_v49  ;;  %v512_v21 = vadd.f32 %v504_v56, %v496_v23  ;;  %v519_v10 = vadd.f32 %v505_v57, %v497_v17  ;;  %v526_v16 = vadd.f32 %v506_v2, %v498_v44 }
  0x98   : > { %v533_v22 = vadd.f32 %v507_v3, %v499_v9  ;;  %v540_v24 = vadd.f32 %v508_v60, %v500_v50  ;;  %v547_v31 = vadd.f32 %v509_v61, %v501_v51  ;;  %v554_v18 = vadd.f32 %v510_v0, %v502_v54 }
  0x99   : > { %v561_v19 = vadd.f32 %v511_v1, %v503_v55  ;;  %v513_v25 = vrot.slane %v512_v21, 4  ;;  %v520_v26 = vrot.slane %v519_v10, 4  ;;  %v527_v30 = vrot.slane %v526_v16, 4 }
  0x9a   : > { %v534_v39 = vrot.slane %v533_v22, 4  ;;  %v541_v43 = vrot.slane %v540_v24, 4  ;;  %v548_v38 = vrot.slane %v547_v31, 4  ;;  %v555_v40 = vrot.slane %v554_v18, 4 }
  0x9b   : > { %v562_v32 = vrot.slane %v561_v19, 4  ;;  %v514_v33 = vadd.f32 %v513_v25, %v512_v21  ;;  %v521_v28 = vadd.f32 %v520_v26, %v519_v10  ;;  %v528_v47 = vadd.f32 %v527_v30, %v526_v16 }
  0x9c   : > { %v535_v29 = vadd.f32 %v534_v39, %v533_v22  ;;  %v542_v23 = vadd.f32 %v541_v43, %v540_v24  ;;  %v549_v17 = vadd.f32 %v548_v38, %v547_v31  ;;  %v556_v44 = vadd.f32 %v555_v40, %v554_v18 }
  0x9d   : > { %v563_v9 = vadd.f32 %v562_v32, %v561_v19  ;;  %v515_v50 = vrot.slane %v514_v33, 2  ;;  %v522_v51 = vrot.slane %v521_v28, 2  ;;  %v529_v54 = vrot.slane %v528_v47, 2 }
  0x9e   : > { %v536_v55 = vrot.slane %v535_v29, 2  ;;  %v543_v56 = vrot.slane %v542_v23, 2  ;;  %v550_v57 = vrot.slane %v549_v17, 2  ;;  %v557_v2 = vrot.slane %v556_v44, 2 }
  0x9f   : > { %v564_v3 = vrot.slane %v563_v9, 2  ;;  %v516_v60 = vadd.f32 %v515_v50, %v514_v33  ;;  %v523_v61 = vadd.f32 %v522_v51, %v521_v28  ;;  %v530_v0 = vadd.f32 %v529_v54, %v528_v47 }
  0xa0   : > { %v537_v1 = vadd.f32 %v536_v55, %v535_v29  ;;  %v544_v21 = vadd.f32 %v543_v56, %v542_v23  ;;  %v551_v10 = vadd.f32 %v550_v57, %v549_v17  ;;  %v558_v16 = vadd.f32 %v557_v2, %v556_v44 }
  0xa1   : > { %v565_v22 = vadd.f32 %v564_v3, %v563_v9  ;;  %v517_v43 = vrot.slane %v516_v60, 1  ;;  %v524_v38 = vrot.slane %v523_v61, 1  ;;  %v531_v40 = vrot.slane %v530_v0, 1 }
  0xa2   : > { %v538_v32 = vrot.slane %v537_v1, 1  ;;  %v545_v24 = vrot.slane %v544_v21, 1  ;;  %v552_v31 = vrot.slane %v551_v10, 1  ;;  %v559_v18 = vrot.slane %v558_v16, 1 }
  0xa3   : > { %v566_v19 = vrot.slane %v565_v22, 1  ;;  %v2079_v25 = vrot.slane %v1809_v62, 1  ;;  %v2080_v28 = vrot.slane %v1811_v63, 1  ;;  %v518_v33 = vadd.f32 %v517_v43, %v516_v60 }
  0xa4   : > { %v525_v47 = vadd.f32 %v524_v38, %v523_v61  ;;  %v532_v30 = vadd.f32 %v531_v40, %v530_v0  ;;  %v539_v39 = vadd.f32 %v538_v32, %v537_v1  ;;  %v546_v23 = vadd.f32 %v545_v24, %v544_v21 }
  0xa5   : > { %v488_v26 = vadd.f32 %v2079_v25, %v1809_v62  ;;  %v495_v29 = vadd.f32 %v2080_v28, %v1811_v63  ;;  %v553_v17 = vadd.f32 %v552_v31, %v551_v10  ;;  %v560_v44 = vadd.f32 %v559_v18, %v558_v16 }
  0xa6   : > { %v568_v9 = vmax.f32 %v1805_v11, 1e-16  ;;  %v569_v50 = vmax.f32 %v1807_v12, 1e-16  ;;  %v570_v51 = vmax.f32 %v1823_v45, 1e-16  ;;  %v567_v54 = vadd.f32 %v566_v19, %v565_v22 }
  0xa7   : > { %v571_v62 = vmax.f32 %v1825_v46, 1e-16  ;;  %v572_v55 = vmax.f32 %v1831_v52, 1e-16  ;;  %v573_v63 = vmax.f32 %v1833_v53, 1e-16 }
  0xa8   : > { %v2081_v56 = vrot.slane %v1784_v4, 4  ;;  %v574_v2 = vmax.f32 %v488_v26, 1e-16  ;;  %v575_v3 = vmax.f32 %v495_v29, 1e-16  ;;  %v2082_v11 = vrot.slane %v1786_v5, 4 }
  0xa9   : > { %v576_v60 = vmax.f32 %v518_v33, 1e-16  ;;  %v577_v61 = vmax.f32 %v525_v47, 1e-16  ;;  %v578_v45 = vmax.f32 %v532_v30, 1e-16 }
  0xaa   : > { %v398_v57 = vadd.f32 %v2081_v56, %v1784_v4  ;;  %v405_v12 = vadd.f32 %v2082_v11, %v1786_v5  ;;  %v579_v0 = vmax.f32 %v539_v39, 1e-16  ;;  %v580_v1 = vmax.f32 %v546_v23, 1e-16 }
  0xab   : > { %v581_v46 = vmax.f32 %v553_v17, 1e-16  ;;  %v582_v21 = vmax.f32 %v560_v44, 1e-16  ;;  %v584_v52 = vmul.f32 %v576_v60, %v568_v9  ;;  %v583_v10 = vmax.f32 %v567_v54, 1e-16 }
  0xac   : > { %v585_v53 = vmul.f32 %v577_v61, %v569_v50  ;;  %v586_v16 = vmul.f32 %v578_v45, %v570_v51  ;;  %v587_v22 = vmul.f32 %v579_v0, %v571_v62  ;;  %v371_v4 = vrot.slane %v1793_v36, 2 }
  0xad   : > { %v2083_v43 = vrot.slane %v1788_v6, 4  ;;  %v588_v40 = vmul.f32 %v580_v1, %v572_v55  ;;  %1274 = vrsqrt.f32 %v584_v52  ;;  %v378_v5 = vrot.slane %v1795_v37, 2 }
  0xae   : > { %v2084_v32 = vrot.slane %v1790_v7, 4  ;;  %v589_v31 = vmul.f32 %v581_v46, %v573_v63  ;;  %1276 = vrsqrt.f32 %v585_v53  ;;  %v385_v18 = vrot.slane %v1801_v58, 2 }
  0xaf   : > { %v412_v38 = vadd.f32 %v2083_v43, %v1788_v6  ;;  %v399_v19 = vrot.slane %v398_v57, 2  ;;  %v590_v25 = vmul.f32 %v582_v21, %v574_v2  ;;  %1278 = vrsqrt.f32 %v586_v16 }
  0xb0   : > { %v419_v24 = vadd.f32 %v2084_v32, %v1790_v7  ;;  %v392_v26 = vrot.slane %v1803_v59, 2  ;;  %v406_v28 = vrot.slane %v405_v12, 2  ;;  %v591_v29 = vmul.f32 %v583_v10, %v575_v3 }
  0xb1   : > { %1280 = vrsqrt.f32 %v587_v22  ;;  %v372_v6 = vadd.f32 %v371_v4, %v1793_v36  ;;  %v413_v33 = vrot.slane %v412_v38, 2  ;;  %v379_v47 = vadd.f32 %v378_v5, %v1795_v37 }
  0xb2   : > { %1282 = vrsqrt.f32 %v588_v40  ;;  %v420_v30 = vrot.slane %v419_v24, 2  ;;  %v386_v7 = vadd.f32 %v385_v18, %v1801_v58  ;;  %v400_v39 = vadd.f32 %v399_v19, %v398_v57 }
  0xb3   : > { %1284 = vrsqrt.f32 %v589_v31  ;;  %v393_v23 = vadd.f32 %v392_v26, %v1803_v59  ;;  %v407_v17 = vadd.f32 %v406_v28, %v405_v12  ;;  %v373_v44 = vrot.slane %v372_v6, 1  ;;  %v661_v28 = vld [vmem:[%s2043_s4] sm:$0xff] }
  0xb4   : > { %1286 = vrsqrt.f32 %v590_v25  ;;  %v414_v9 = vadd.f32 %v413_v33, %v412_v38  ;;  %v380_v50 = vrot.slane %v379_v47, 1  ;;  %v421_v51 = vadd.f32 %v420_v30, %v419_v24 }
  0xb5   : > { %1288 = vrsqrt.f32 %v591_v29  ;;  %v387_v54 = vrot.slane %v386_v7, 1  ;;  %v401_v36 = vrot.slane %v400_v39, 1  ;;  %v394_v62 = vrot.slane %v393_v23, 1  ;;  %v662_v29 = vld [vmem:[%s2043_s4 + $0x8] sm:$0xff] }
  0xb6   : > { %v408_v55 = vrot.slane %v407_v17, 1  ;;  %v374_v63 = vadd.f32 %v373_v44, %v372_v6  ;;  %v415_v37 = vrot.slane %v414_v9, 1  ;;  %v381_v2 = vadd.f32 %v380_v50, %v379_v47 }
  0xb7   : > { %v422_v3 = vrot.slane %v421_v51, 1  ;;  %v388_v57 = vadd.f32 %v387_v54, %v386_v7  ;;  %v402_v60 = vadd.f32 %v401_v36, %v400_v39  ;;  %v395_v59 = vadd.f32 %v394_v62, %v393_v23 }
  0xb8   : > { %v409_v12 = vadd.f32 %v408_v55, %v407_v17  ;;  %v416_v45 = vadd.f32 %v415_v37, %v414_v9  ;;  %v1465_v26 = vmov 0.0   ;;  %v1466_v6 = vmov 0  }
  0xb9   : > { %v423_v46 = vadd.f32 %v422_v3, %v421_v51  ;;  %784 = vmatprep.mubr.f32.mxu0 %v1465_v26  ;;  %861 = vmatprep.mubr.f32.mxu1 %v1465_v26 }
  0xba   : > { %v1275_v56 = vpop.eup %1274  ;;  %1272 = vset.pattern.permute.xlu0 %v1466_v6  ;;  %1273 = vset.pattern.permute.xlu1 %v1466_v6 }
  0xbb   : > { %v1277_v58 = vpop.eup %1276  ;;  %v600_v0 = vmul.f32 %v1275_v56, %v374_v63  ;;  %710 = vperm.xlu1 %1273, %v662_v29  }
  0xbc   : > { %v1279_v11 = vpop.eup %1278  ;;  %v601_v21 = vmul.f32 %v1277_v58, %v381_v2 }
  0xbd   : > { %v602_v10 = vmul.f32 %v1279_v11, %v388_v57 }
  0xbe   : > { %v1281_v61 = vpop.eup %1280 }
  0xbf   : > { %v1283_v1 = vpop.eup %1282  ;;  %v603_v22 = vmul.f32 %v1281_v61, %v395_v59 }
  0xc0   : > { %v1285_v52 = vpop.eup %1284  ;;  %v604_v53 = vmul.f32 %v1283_v1, %v402_v60 }
  0xc1   : > { %v1287_v16 = vpop.eup %1286  ;;  %v605_v4 = vmul.f32 %v1285_v52, %v409_v12  ;;  %v651_v52 = vld [vmem:[%s1901_s12 + $0x40] sm:$0xff] }
  0xc2   : > { %v1289_v43 = vpop.eup %1288  ;;  %v606_v38 = vmul.f32 %v1287_v16, %v416_v45  ;;  %v608_v40 = vmax.f32 %v600_v0, %v604_v53  ;;  %v644_v16 = vld [vmem:[%s1901_s12 + $0x8] sm:$0xff] }
  0xc3   : > { %v607_v5 = vmul.f32 %v1289_v43, %v423_v46  ;;  %v609_v32 = vmax.f32 %v601_v21, %v605_v4  ;;  %v652_v46 = vld [vmem:[%s1901_s12 + $0x48] sm:$0xff] }
  0xc4   : > { %v610_v24 = vmax.f32 %v602_v10, %v606_v38 }
  0xc5   : > { %v611_v31 = vmax.f32 %v603_v22, %v607_v5  ;;  %v612_v18 = vmax.f32 %v608_v40, %v609_v32 }
  0xc7   : > { %v613_v19 = vmax.f32 %v610_v24, %v611_v31  ;;  %v645_v31 = vld [vmem:[%s1901_s12 + $0x10] sm:$0xff] }
  0xc9   : > { %v614_v25 = vmax.f32 %v612_v18, %v613_v19 }
  0xcb   : > { %615 = vmax.xlane.f32.xlu0 %v614_v25 }
  0xe1   : > { %705 = vperm.xlu0 %1272, %v661_v28  }
 0x154   : > { %v616_v33 = vpop.xlane.xlu0 %615 }
 0x155   : > { %1208 = vpush %v616_v33 }
 0x186   : > { %s1209_s6 = spop %1208 }
 0x187   : > { %v618_v47 = vstv %s1209_s6 }
 0x188   : > { %v619_v30 = vsub.f32 %v600_v0, %v618_v47  ;;  %v620_v7 = vsub.f32 %v601_v21, %v618_v47  ;;  %v621_v39 = vsub.f32 %v602_v10, %v618_v47  ;;  %v622_v23 = vsub.f32 %v603_v22, %v618_v47 }
 0x189   : > { %v623_v17 = vsub.f32 %v604_v53, %v618_v47  ;;  %v624_v44 = vsub.f32 %v605_v4, %v618_v47  ;;  %v626_v54 = vsub.f32 %v607_v5, %v618_v47  ;;  %v625_v62 = vsub.f32 %v606_v38, %v618_v47  ;;  %v654_v53 = vld [vmem:[%s1901_s12 + $0x58] sm:$0xff]  ;;  %v643_v38 = vld [vmem:[%s1901_s12] sm:$0xff] }
 0x18a   : > { %v627_v9 = vmul.f32 1.442695, %v619_v30  ;;  %v629_v50 = vmul.f32 1.442695, %v620_v7  ;;  %v631_v51 = vmul.f32 1.442695, %v621_v39 }
 0x18b   : > { %v633_v36 = vmul.f32 1.442695, %v622_v23  ;;  %v635_v55 = vmul.f32 1.442695, %v623_v17  ;;  %v637_v63 = vmul.f32 1.442695, %v624_v44 }
 0x18c   : > { %1290 = vpow2.f32 %v627_v9  ;;  %v641_v37 = vmul.f32 1.442695, %v626_v54  ;;  %v639_v56 = vmul.f32 1.442695, %v625_v62  ;;  %v646_v5 = vld [vmem:[%s1901_s12 + $0x18] sm:$0xff]  ;;  %v2085_v39 = vld [vmem:[#allocation15_spill] sm:$0xff] }
 0x18d   : > { %1292 = vpow2.f32 %v629_v50  ;;  %v658_v44 = vld [vmem:[%s1901_s12 + $0x78] sm:$0xff]  ;;  %v2088_v50 = vld [vmem:[#allocation16_spill] sm:$0xff]  ;;  %v655_v54 = vld [vmem:[%s1901_s12 + $0x60] sm:$0xff] }
 0x18e   : > { %1294 = vpow2.f32 %v631_v51  ;;  %v660_v51 = vld [vmem:[%s2042_s3 + $0x8] sm:$0xff] }
 0x18f   : > { %1296 = vpow2.f32 %v633_v36  ;;  %v657_v36 = vld [vmem:[%s1901_s12 + $0x70] sm:$0xff]  ;;  %v648_v62 = vld [vmem:[%s1901_s12 + $0x28] sm:$0xff] }
 0x190   : > { %1298 = vpow2.f32 %v635_v55  ;;  %v650_v55 = vld [vmem:[%s1901_s12 + $0x38] sm:$0xff] }
 0x191   : > { %1300 = vpow2.f32 %v637_v63 }
 0x192   : > { %1302 = vpow2.f32 %v641_v37 }
 0x193   : > { %1304 = vpow2.f32 %v639_v56  ;;  %v647_v56 = vld [vmem:[%s1901_s12 + $0x20] sm:$0xff] }
 0x199   : > { %v1291_v2 = vpop.eup %1290 }
 0x19a   : > { %v1293_v3 = vpop.eup %1292  ;;  %v679_v58 = vsub.f32 1.0, %v1291_v2  ;;  %v671_v40 = vmul.f32 %v1291_v2, %v651_v52  ;;  %v663_v19 = vmul.f32 %v1291_v2, %v643_v38 }
 0x19b   : > { %v1295_v57 = vpop.eup %1294  ;;  %v680_v60 = vsub.f32 1.0, %v1293_v3  ;;  %v672_v43 = vmul.f32 %v1293_v3, %v652_v46  ;;  %v664_v24 = vmul.f32 %v1293_v3, %v644_v16 }
 0x19c   : > { %v1297_v11 = vpop.eup %1296  ;;  %v695_v59 = vmul.f32 %v679_v58, %v1717_v14  ;;  %v681_v12 = vsub.f32 1.0, %v1295_v57  ;;  %v665_v6 = vmul.f32 %v1295_v57, %v645_v31 }
 0x19d   : > { %v696_v61 = vmul.f32 %v680_v60, %v1720_v15  ;;  %v682_v45 = vsub.f32 1.0, %v1297_v11  ;;  %v1897_v0 = vpop.eup %1298  ;;  %v688_v15 = vmul.f32 %v680_v60, %v1714_v13  ;;  %v674_v32 = vmul.f32 %v1297_v11, %v654_v53 }
 0x19e   : > { %v697_v1 = vmul.f32 %v681_v12, %v1750_v34  ;;  %v1904_v21 = vpop.eup %1300  ;;  %v687_v34 = vmul.f32 %v679_v58, %v1706_v8  ;;  %v689_v13 = vmul.f32 %v681_v12, %v1727_v20  ;;  %v659_v20 = vld [vmem:[%s2042_s3] sm:$0xff]  ;;  %v683_v25 = vsub.f32 1.0, %v1897_v0  ;;  %v649_v58 = vld [vmem:[%s1901_s12 + $0x30] sm:$0xff]  ;;  %v706_v12 = vpop.permute.xlu0 %705 }
 0x19f   : > { %744 = vmatprep.subr.mxu0 %v696_v61  ;;  %v698_v14 = vmul.f32 %v682_v45, %v1753_v35  ;;  %v1909_v10 = vpop.eup %1302  ;;  %v690_v4 = vmul.f32 %v682_v45, %v1736_v27  ;;  %v653_v35 = vld [vmem:[%s1901_s12 + $0x50] sm:$0xff]  ;;  %v684_v8 = vsub.f32 1.0, %v1904_v21  ;;  %v666_v29 = vmul.f32 %v1297_v11, %v646_v5 }
 0x1a0   : > { %745 = vmatpush1.msra.mxu0 %v695_v59  ;;  %v1914_v22 = vpop.eup %1304  ;;  %v686_v18 = vsub.f32 1.0, %v1909_v10  ;;  %v673_v27 = vmul.f32 %v1295_v57, %v653_v35  ;;  %v699_v30 = vmul.f32 %v683_v25, %v1761_v41  ;;  %v2087_v41 = vld [vmem:[#allocation14_spill] sm:$0xff]  ;;  %v678_v37 = vmul.f32 %v1909_v10, %v658_v44 }
 0x1a1   : > { %821 = vmatprep.subr.mxu1 %v698_v14  ;;  %746 = vmatprep.subr.mxu0 %v688_v15  ;;  %v685_v28 = vsub.f32 1.0, %v1914_v22  ;;  %v700_v33 = vmul.f32 %v684_v8, %v1764_v42  ;;  %v692_v23 = vmul.f32 %v684_v8, %v2085_v39  ;;  %v2086_v42 = vld [vmem:[#allocation17_spill] sm:$0xff]  ;;  %v691_v9 = vmul.f32 %v683_v25, %v2087_v41  ;;  %v711_v15 = vpop.permute.xlu1 %710 }
 0x1a2   : > { %822 = vmatpush1.msra.mxu1 %v697_v1  ;;  %747 = vmatpush1.msra.mxu0 %v687_v34  ;;  %v702_v47 = vmul.f32 %v686_v18, %v1777_v49  ;;  %v694_v17 = vmul.f32 %v686_v18, %v2086_v42  ;;  %v656_v49 = vld [vmem:[%s1901_s12 + $0x68] sm:$0xff]  ;;  %v675_v2 = vmul.f32 %v1897_v0, %v655_v54 }
 0x1a3   : > { %823 = vmatprep.subr.mxu1 %v690_v4  ;;  %748 = vmatprep.subr.mxu0 %v672_v43  ;;  %v701_v7 = vmul.f32 %v685_v28, %v1774_v48  ;;  %v693_v48 = vmul.f32 %v685_v28, %v2088_v50  ;;  %v676_v63 = vmul.f32 %v1904_v21, %v656_v49 }
 0x1a4   : > { %824 = vmatpush1.msra.mxu1 %v689_v13  ;;  %749 = vmatpush1.msra.mxu0 %v671_v40  ;;  %v677_v3 = vmul.f32 %v1914_v22, %v657_v36  ;;  %v668_v57 = vmul.f32 %v1904_v21, %v648_v62  ;;  %v670_v60 = vmul.f32 %v1909_v10, %v650_v55 }
 0x1a5   : > { %825 = vmatprep.subr.mxu1 %v674_v32  ;;  %750 = vmatprep.subr.mxu0 %v664_v24  ;;  %v667_v11 = vmul.f32 %v1897_v0, %v647_v56  ;;  %v669_v59 = vmul.f32 %v1914_v22, %v649_v58 }
 0x1a6   : > { %826 = vmatpush1.msra.mxu1 %v673_v27  ;;  %751 = vmatpush1.msra.mxu0 %v663_v19 }
 0x1a7   : > { %827 = vmatprep.subr.mxu1 %v666_v29  ;;  %1191 = vmatmul.mubr.msk.f32.vlgmr.msra.gmra.mxu0 %vm713_vm0, %v659_v20 }
 0x1a8   : > { %828 = vmatpush1.msra.mxu1 %v665_v6  ;;  %898 = vmatprep.subr.mxu0 %v700_v33 }
 0x1a9   : > { %1193 = vmatmul.mubr.msk.f32.vlgmr.msra.gmra.mxu1 %vm713_vm0, %v659_v20  ;;  %975 = vmatprep.subr.mxu1 %v702_v47 }
 0x1aa   : > { %899 = vmatpush1.msra.mxu0 %v699_v30  ;;  %976 = vmatpush1.msra.mxu1 %v701_v7 }
 0x1ab   : > { %900 = vmatprep.subr.mxu0 %v692_v23  ;;  %977 = vmatprep.subr.mxu1 %v694_v17 }
 0x1ac   : > { %790 = vmatprep.mubr.f32.mxu0 %v1465_v26  ;;  %867 = vmatprep.mubr.f32.mxu1 %v1465_v26 }
 0x1ad   : > { %901 = vmatpush1.msra.mxu0 %v691_v9  ;;  %978 = vmatpush1.msra.mxu1 %v693_v48 }
 0x1ae   : > { %1192 = vmatmul.mubr.msk.f32.gmra.mxu0 %vm713_vm0, %v660_v51  ;;  %1194 = vmatmul.mubr.msk.f32.gmra.mxu1 %vm713_vm0, %v660_v51 }
 0x1af   : > { %902 = vmatprep.subr.mxu0 %v676_v63  ;;  %979 = vmatprep.subr.mxu1 %v678_v37 }
 0x1b0   : > { %903 = vmatpush1.msra.mxu0 %v675_v2  ;;  %980 = vmatpush1.msra.mxu1 %v677_v3 }
 0x1b1   : > { %904 = vmatprep.subr.mxu0 %v668_v57  ;;  %981 = vmatprep.subr.mxu1 %v670_v60 }
 0x1b2   : > { %905 = vmatpush1.msra.mxu0 %v667_v11  ;;  %938 = vmatprep.mubr.f32.mxu0 %v1465_v26 }
 0x1b3   : > { %982 = vmatpush1.msra.mxu1 %v669_v59  ;;  %1015 = vmatprep.mubr.f32.mxu1 %v1465_v26 }
 0x1b4   : > { %1195 = vmatmul.mubr.msk.f32.vlgmr.msra.gmra.mxu0 %vm713_vm0, %v659_v20  ;;  %1197 = vmatmul.mubr.msk.f32.vlgmr.msra.gmra.mxu1 %vm713_vm0, %v659_v20 }
 0x1b5   : > { %944 = vmatprep.mubr.f32.mxu0 %v1465_v26  ;;  %1021 = vmatprep.mubr.f32.mxu1 %v1465_v26 }
 0x1b8   : > { %1196 = vmatmul.mubr.msk.f32.gmra.mxu0 %vm713_vm0, %v660_v51  ;;  %1198 = vmatmul.mubr.msk.f32.gmra.mxu1 %vm713_vm0, %v660_v51 }
 0x267   : > { %v786_v61 = vpop.f32.mrf.mxu0 }
 0x268   : > { %v787_v45 = vadd.f32 %v786_v61, %v706_v12 }
 0x269   : > { %v863_v0 = vpop.f32.mrf.mxu1  ;;  %v788_v1 = vpop.f32.mrf.mxu0 }
 0x26a   : > { %v864_v46 = vadd.f32 %v863_v0, %v706_v12  ;;  %1028 = vst [vmem:[%s1971_s8] sm:$0xff] %v787_v45  ;;  %v789_v26 = vadd.f32 %v788_v1, %v706_v12 }
 0x26b   : > { %v865_v21 = vpop.f32.mrf.mxu1 }
 0x26c   : > { %1030 = vst [vmem:[%s1971_s8 + $0x10] sm:$0xff] %v864_v46  ;;  %1029 = vst [vmem:[%s1971_s8 + $0x8] sm:$0xff] %v789_v26  ;;  %v866_v14 = vadd.f32 %v865_v21, %v706_v12 }
 0x26e   : > { %1031 = vst [vmem:[%s1971_s8 + $0x18] sm:$0xff] %v866_v14  ;;  %v792_v52 = vpop.f32.mrf.mxu0  ;;  %v869_v10 = vpop.f32.mrf.mxu1 }
 0x26f   : > { %v793_v34 = vadd.f32 %v792_v52, %v711_v15  ;;  %v870_v53 = vadd.f32 %v869_v10, %v711_v15 }
 0x270   : > { %v794_v16 = vpop.f32.mrf.mxu0  ;;  %v871_v22 = vpop.f32.mrf.mxu1 }
 0x271   : > { %1036 = vst [vmem:[%s1971_s8 + $0x40] sm:$0xff] %v793_v34  ;;  %1038 = vst [vmem:[%s1971_s8 + $0x50] sm:$0xff] %v870_v53  ;;  %v795_v4 = vadd.f32 %v794_v16, %v711_v15  ;;  %v872_v43 = vadd.f32 %v871_v22, %v711_v15 }
 0x273   : > { %1037 = vst [vmem:[%s1971_s8 + $0x48] sm:$0xff] %v795_v4  ;;  %1039 = vst [vmem:[%s1971_s8 + $0x58] sm:$0xff] %v872_v43 }
 0x274   : > { %v940_v35 = vpop.f32.mrf.mxu0  ;;  %v1017_v38 = vpop.f32.mrf.mxu1 }
 0x275   : > { %v941_v13 = vadd.f32 %v940_v35, %v706_v12  ;;  %v1018_v40 = vadd.f32 %v1017_v38, %v706_v12 }
 0x276   : > { %v942_v5 = vpop.f32.mrf.mxu0  ;;  %v1019_v8 = vpop.f32.mrf.mxu1 }
 0x277   : > { %1032 = vst [vmem:[%s1971_s8 + $0x20] sm:$0xff] %v941_v13  ;;  %1034 = vst [vmem:[%s1971_s8 + $0x30] sm:$0xff] %v1018_v40  ;;  %v943_v32 = vadd.f32 %v942_v5, %v706_v12  ;;  %v1020_v24 = vadd.f32 %v1019_v8, %v706_v12 }
 0x278   : > { %v946_v31 = vpop.f32.mrf.mxu0  ;;  %v1023_v18 = vpop.f32.mrf.mxu1 }
 0x279   : > { %1033 = vst [vmem:[%s1971_s8 + $0x28] sm:$0xff] %v943_v32  ;;  %1035 = vst [vmem:[%s1971_s8 + $0x38] sm:$0xff] %v1020_v24  ;;  %v947_v27 = vadd.f32 %v946_v31, %v711_v15  ;;  %v1024_v19 = vadd.f32 %v1023_v18, %v711_v15 }
 0x27a   : > { %v948_v20 = vpop.f32.mrf.mxu0  ;;  %v1025_v25 = vpop.f32.mrf.mxu1 }
 0x27b   : > { %1040 = vst [vmem:[%s1971_s8 + $0x60] sm:$0xff] %v947_v27  ;;  %1042 = vst [vmem:[%s1971_s8 + $0x70] sm:$0xff] %v1024_v19  ;;  %v949_v28 = vadd.f32 %v948_v20, %v711_v15  ;;  %v1026_v29 = vadd.f32 %v1025_v25, %v711_v15 }
 0x27d   : > { %1041 = vst [vmem:[%s1971_s8 + $0x68] sm:$0xff] %v949_v28  ;;  %1043 = vst [vmem:[%s1971_s8 + $0x78] sm:$0xff] %v1026_v29 }
 0x27e   : > { %1403 = shalt.err (!%p1400_p6)
}
 0x27f   : > { %s1404_s17 = scalar_lea.hbm %s1990_s9, 2048  ;;  %s1408_s6 = scalar_lea.hbm %s2044_s5, 4096 }
 0x280   : > { %p1405_p12 = scmp.ne.s32.totalorder %s1990_s9, %s1404_s17  ;;  %p1409_p4 = scmp.lt.s32.totalorder %s1990_s9, %s2044_s5 }
 0x281   : > { %p1410_p2 = scmp.lt.s32.totalorder %s1408_s6, %s1404_s17 }
 0x282   : > { %p1406_p0 = pnand %p1405_p12, %p2089_p7 }
 0x283   : > { %p1411_p5 = por %p1410_p2, %p1409_p4 }
 0x284   : > { %p1407_p11 = pneg %p1406_p0 }
 0x286   : > { %p1412_p13 = pnand %p1411_p5, %p1407_p11 }
 0x288   : > { %1415 = shalt.err (!%p1412_p13)
}
 0x289   : > { %s1468_s26 = smov 1024   ;;  %s1469_s13 = smov 64  }
 0x28a   : > { %1216 = dma.vmem_to_hbm [thread:$0]  (%p2089_p7), %s1992_s15, 2048, %s1990_s9, %s1045_s22, %s1468_s26, %s1468_s26, %s1469_s13  }
 0x28b PF: > { %s1073_s7 = sand.u32 1, %s1446_s18   ;;  %p2090_p8 = scmp.ne.s32.totalorder %s2063_s30, 0 }
 0x28c   : > { %p2091_p10 = scmp.ge.s32.totalorder %s1458_s21, 2  ;;  %s1074_s8 = scalar_lea.sflag [#allocation4], %s1073_s7 }
 0x28e   : > { %p1229_p1 = pnand %p2091_p10, %p2090_p8 }
 0x290   : > { %p1230_p3 = pneg %p1229_p1 }
 0x292   : > { %1441 = dma.done.wait (%p1230_p3), %s1074_s8, 2048  }
 0x293   : > { %1443 = vsyncadd (%p1230_p3), %s1074_s8, 4294965248  ;;  %s2092_s11 = sld [smem:[#allocation12_spill]]  ;;  %p21_p9 = scmp.ge.s32.totalorder %s1525_s24, 4  }
 0x294   : > { %s2093_s20 = sld [smem:[#allocation13_spill]]  ;;  %s2094_s18 = smov %s1450_s19 }
 0x295   : > { %s2096_s21 = smov %s1525_s24  ;;  %23 = sbr.rel (!%p21_p9) target bundleno = 10 (0xa), region = 109 }
 0x299   : > { %s2095_s19 = smov %s2092_s11 }
 0x29a   :  { %1079 = vsyncpa [#allocation3], 1 }
 0x29b   :  { %1081 = vsyncpa [#allocation3 + $0x1], 1 }
 0x29c   :  { %1082 = vsyncpa [#allocation6], 1 }
 0x29d   :  { %1084 = vsyncpa [#allocation6 + $0x1], 1 }
 0x29e   :  { %1085 = vsyncpa [#allocation4], 1 }
 0x29f   :  { %1087 = vsyncpa [#allocation4 + $0x1], 1 }

</bundles_post_ra>
